<compile_context>
chip_gen: v7x
topology: tpu7x:2x2x1
jax: 0.10.0
libtpu: 0.0.40
codegen_flags: <defaults>
</compile_context>

<pallas_src>
import jax
import jax.numpy as jnp
from jax.experimental import pallas as pl
from jax.experimental.pallas import tpu as pltpu


def att3s_kernel(v_ref, q_ref,
                 wv_ref, bv_ref,
                 wq_ref, bq_ref,
                 wn_ref, bn_ref,
                 wl_ref, bl_ref,
                 out_ref):
    TM = v_ref.shape[0]          # rows in this tile (= TB * K)
    TB = q_ref.shape[0]          # batch rows in this tile
    K = TM // TB                 # objects per batch row
    H = wv_ref.shape[1]

    # ---- v path: ReLU(v @ Wv + bv)   (bf16 operands -> f32 accumulate on MXU) ----
    vp = jnp.dot(v_ref[...], wv_ref[...], preferred_element_type=jnp.float32)
    vp = jnp.maximum(vp + bv_ref[...], 0.0)                          # (TM, H) f32

    # ---- q path: computed ONCE per batch row (K-fold dedup vs. torch .repeat) ----
    qp = jnp.dot(q_ref[...], wq_ref[...], preferred_element_type=jnp.float32)
    qp = jnp.maximum(qp + bq_ref[...], 0.0)                          # (TB, H) f32

    # Broadcast each batch row of qp across its K object rows, entirely in-register
    # (no K-fold HBM traffic and no K-fold MXU flops for the q projection).
    qp_rep = jnp.concatenate(
        [jnp.broadcast_to(qp[b:b + 1, :], (K, H)) for b in range(TB)], axis=0)

    joint = vp * qp_rep                                              # (TM, H) f32

    # ---- nonlinear: ReLU(joint @ Wn + bn) ----
    h = jnp.dot(joint.astype(wn_ref.dtype), wn_ref[...],
                preferred_element_type=jnp.float32)
    h = jnp.maximum(h + bn_ref[...], 0.0)                            # (TM, H) f32

    # ---- final [H,1] projection as VPU multiply + cross-lane reduce (MXU stays free) ----
    logits = jnp.sum(h * wl_ref[...], axis=-1, keepdims=True) + bl_ref[0]   # (TM, 1)

    # leaky_relu, negative_slope = 0.01 (PyTorch default)
    out_ref[...] = jnp.where(logits >= 0.0, logits, 0.01 * logits)


def _choose_block_batch(B, K, target_rows=512):
    """Pick TB (batch rows per tile): TB | B, TB % 8 == 0 (or TB == B), TB*K <= target."""
    candidates = [tb for tb in range(1, B + 1)
                  if B % tb == 0 and (tb % 8 == 0 or tb == B)]
    small = [tb for tb in candidates if tb * K <= target_rows]
    if small:
        return max(small)
    return min(candidates)      # B is always a candidate, so this is non-empty


def att_3s_forward(v, q, params, *, block_batch=None, compute_dtype=jnp.bfloat16):
    """v: [B, K, v_dim], q: [B, q_dim] -> [B, K, 1] (float32)."""
    B, K, v_dim = v.shape
    q_dim = q.shape[-1]
    H = params["wv"].shape[1]
    M = B * K
    f32 = jnp.float32

    TB = block_batch if block_batch is not None else _choose_block_batch(B, K)
    assert B % TB == 0 and (TB % 8 == 0 or TB == B), "invalid block_batch for tiling"
    TM = TB * K
    nb = B // TB

    # Free layout plumbing at the XLA level (contiguous reshape / dtype cast).
    v_flat = v.reshape(M, v_dim).astype(compute_dtype)        # [M, v_dim]   bf16
    q2d = q.astype(compute_dtype)                             # [B, q_dim]   bf16 (no repeat!)

    wv = params["wv"].astype(compute_dtype)
    wq = params["wq"].astype(compute_dtype)
    wn = params["wn"].astype(compute_dtype)
    bv = params["bv"].astype(f32)
    bq = params["bq"].astype(f32)
    bn = params["bn"].astype(f32)
    wl_row = params["wl"].reshape(1, H).astype(f32)           # used on the VPU, keep f32
    bl = params["bl"].reshape(1).astype(f32)                  # scalar -> SMEM

    out = pl.pallas_call(
        att3s_kernel,
        out_shape=jax.ShapeDtypeStruct((M, 1), f32),
        grid=(nb,),
        in_specs=[
            pl.BlockSpec((TM, v_dim), lambda i: (i, 0)),              # v tile (pipelined)
            pl.BlockSpec((TB, q_dim), lambda i: (i, 0)),              # q tile (pipelined)
            pl.BlockSpec((v_dim, H), lambda i: (0, 0)),               # Wv  (resident)
            pl.BlockSpec((1, H), lambda i: (0, 0)),                   # bv  (resident)
            pl.BlockSpec((q_dim, H), lambda i: (0, 0)),               # Wq  (resident)
            pl.BlockSpec((1, H), lambda i: (0, 0)),                   # bq  (resident)
            pl.BlockSpec((H, H), lambda i: (0, 0)),                   # Wn  (resident)
            pl.BlockSpec((1, H), lambda i: (0, 0)),                   # bn  (resident)
            pl.BlockSpec((1, H), lambda i: (0, 0)),                   # wl row (resident)
            pl.BlockSpec(memory_space=pltpu.MemorySpace.SMEM),        # bl scalar in SMEM
        ],
        out_specs=pl.BlockSpec((TM, 1), lambda i: (i, 0)),
        compiler_params=pltpu.CompilerParams(
            dimension_semantics=("parallel",),        # shard M-tiles across TCs on v7x
            vmem_limit_bytes=48 * 1024 * 1024,        # above 32MiB default, below v7x 64MiB
        ),
    )(v_flat, q2d, wv, bv, wq, bq, wn, bn, wl_row, bl)

    return out.reshape(B, K, 1)


def _weight_norm_fold(w, g):
    # weight_norm(..., dim=None): W_eff = g * W / ||W||_F  (g is a scalar)
    return g * w / jnp.sqrt(jnp.sum(w * w))


def make_params(key, v_dim, q_dim, num_hid):
    ks = jax.random.split(key, 8)

    def lin(kw, kb, fan_in, fan_out):
        bound = 1.0 / jnp.sqrt(fan_in)
        w = jax.random.uniform(kw, (fan_in, fan_out), jnp.float32, -bound, bound)
        b = jax.random.uniform(kb, (1, fan_out), jnp.float32, -bound, bound)
        g = jnp.sqrt(jnp.sum(w * w))          # at PyTorch init, g = ||W||_F
        return _weight_norm_fold(w, g), b

    wv, bv = lin(ks[0], ks[1], v_dim, num_hid)
    wq, bq = lin(ks[2], ks[3], q_dim, num_hid)
    wn, bn = lin(ks[4], ks[5], num_hid, num_hid)
    wl, bl = lin(ks[6], ks[7], num_hid, 1)
    return dict(wv=wv, bv=bv, wq=wq, bq=bq, wn=wn, bn=bn, wl=wl, bl=bl)


def att_3s_reference(v, q, p, compute_dtype=jnp.bfloat16):
    """Pure-JAX reference with the same dtype policy as the kernel (bf16 MXU, f32 accum)."""
    cd, f32 = compute_dtype, jnp.float32
    vp = jnp.maximum(jnp.dot(v.astype(cd), p["wv"].astype(cd),
                             preferred_element_type=f32) + p["bv"], 0.0)       # (B,K,H)
    qp = jnp.maximum(jnp.dot(q.astype(cd), p["wq"].astype(cd),
                             preferred_element_type=f32) + p["bq"], 0.0)       # (B,H)
    joint = vp * qp[:, None, :]
    h = jnp.maximum(jnp.dot(joint.astype(cd), p["wn"].astype(cd),
                            preferred_element_type=f32) + p["bn"], 0.0)
    logits = jnp.sum(h * p["wl"].reshape(1, 1, -1), axis=-1, keepdims=True) + p["bl"].reshape(())
    return jnp.where(logits >= 0.0, logits, 0.01 * logits)


if __name__ == "__main__":
    # Small shapes consistent with the module: v [B, K, v_dim], q [B, q_dim].
    # block_batch=8 gives TM=64 rows/tile and a 2-step grid, exercising the tiled path.
    B, K, v_dim, q_dim, num_hid = 16, 8, 32, 32, 32

    key = jax.random.PRNGKey(0)
    kv, kq, kp = jax.random.split(key, 3)
    v = jax.random.normal(kv, (B, K, v_dim), jnp.float32)
    q = jax.random.normal(kq, (B, q_dim), jnp.float32)
    params = make_params(kp, v_dim, q_dim, num_hid)

    out = att_3s_forward(v, q, params, block_batch=8)
    out = jax.block_until_ready(out)

    ref = att_3s_reference(v, q, params)
    assert out.shape == (B, K, 1)
    assert jnp.allclose(out, ref, atol=1e-2, rtol=1e-2), float(jnp.max(jnp.abs(out - ref)))

    print("KERNEL_OK")
</pallas_src>

<mosaic_0001>
module attributes {stable_mosaic.version = 11 : i64} {
  func.func @att3s_kernel(%arg0: i32, %arg1: memref<64x32xbf16, #tpu.memory_space<vmem>>, %arg2: memref<8x32xbf16, #tpu.memory_space<vmem>>, %arg3: memref<32x32xbf16, #tpu.memory_space<vmem>>, %arg4: memref<1x32xf32, #tpu.memory_space<vmem>>, %arg5: memref<32x32xbf16, #tpu.memory_space<vmem>>, %arg6: memref<1x32xf32, #tpu.memory_space<vmem>>, %arg7: memref<32x32xbf16, #tpu.memory_space<vmem>>, %arg8: memref<1x32xf32, #tpu.memory_space<vmem>>, %arg9: memref<1x32xf32, #tpu.memory_space<vmem>>, %arg10: memref<1xf32, #tpu.memory_space<smem>>, %arg11: memref<64x1xf32, #tpu.memory_space<vmem>>) attributes {dimension_semantics = [#tpu.dimension_semantics<parallel>], iteration_bounds = array<i64: 2>, scalar_prefetch = 0 : i64, scratch_operands = 0 : i64, tpu.core_type = #tpu.core_type<tc>, window_params = [{transform_indices = @transform_0, window_bounds = array<i64: 64, 32>}, {transform_indices = @transform_1, window_bounds = array<i64: 8, 32>}, {pipeline_mode = #tpu.pipeline_mode<synchronous>, transform_indices = @transform_2, window_bounds = array<i64: 32, 32>}, {pipeline_mode = #tpu.pipeline_mode<synchronous>, transform_indices = @transform_3, window_bounds = array<i64: 1, 32>}, {pipeline_mode = #tpu.pipeline_mode<synchronous>, transform_indices = @transform_4, window_bounds = array<i64: 32, 32>}, {pipeline_mode = #tpu.pipeline_mode<synchronous>, transform_indices = @transform_5, window_bounds = array<i64: 1, 32>}, {pipeline_mode = #tpu.pipeline_mode<synchronous>, transform_indices = @transform_6, window_bounds = array<i64: 32, 32>}, {pipeline_mode = #tpu.pipeline_mode<synchronous>, transform_indices = @transform_7, window_bounds = array<i64: 1, 32>}, {pipeline_mode = #tpu.pipeline_mode<synchronous>, transform_indices = @transform_8, window_bounds = array<i64: 1, 32>}, {transform_indices = @transform_9, window_bounds = array<i64: 1>}, {transform_indices = @transform_10, window_bounds = array<i64: 64, 1>}]} {
    %c0 = arith.constant 0 : index
    %c0_0 = arith.constant 0 : index
    %0 = vector.load %arg1[%c0, %c0_0] : memref<64x32xbf16, #tpu.memory_space<vmem>>, vector<64x32xbf16>
    %c0_1 = arith.constant 0 : index
    %c0_2 = arith.constant 0 : index
    %1 = vector.load %arg3[%c0_1, %c0_2] : memref<32x32xbf16, #tpu.memory_space<vmem>>, vector<32x32xbf16>
    %cst = arith.constant dense<0.000000e+00> : vector<64x32xf32>
    %2 = tpu.matmul %0, %1, %cst {dimension_numbers = #tpu.dot_dimension_numbers<[1], [0], [0], [1], [0, 0, 1, 1], [], []>} : vector<64x32xbf16>, vector<32x32xbf16>, vector<64x32xf32> -> vector<64x32xf32>
    %c0_3 = arith.constant 0 : index
    %c0_4 = arith.constant 0 : index
    %3 = vector.load %arg4[%c0_3, %c0_4] : memref<1x32xf32, #tpu.memory_space<vmem>>, vector<1x32xf32>
    %4 = vector.broadcast %3 : vector<1x32xf32> to vector<64x32xf32>
    %5 = arith.addf %2, %4 : vector<64x32xf32>
    %cst_5 = arith.constant 0.000000e+00 : f32
    %6 = vector.broadcast %cst_5 : f32 to vector<64x32xf32>
    %7 = arith.maximumf %5, %6 : vector<64x32xf32>
    %c0_6 = arith.constant 0 : index
    %c0_7 = arith.constant 0 : index
    %8 = vector.load %arg2[%c0_6, %c0_7] : memref<8x32xbf16, #tpu.memory_space<vmem>>, vector<8x32xbf16>
    %c0_8 = arith.constant 0 : index
    %c0_9 = arith.constant 0 : index
    %9 = vector.load %arg5[%c0_8, %c0_9] : memref<32x32xbf16, #tpu.memory_space<vmem>>, vector<32x32xbf16>
    %cst_10 = arith.constant dense<0.000000e+00> : vector<8x32xf32>
    %10 = tpu.matmul %8, %9, %cst_10 {dimension_numbers = #tpu.dot_dimension_numbers<[1], [0], [0], [1], [0, 0, 1, 1], [], []>} : vector<8x32xbf16>, vector<32x32xbf16>, vector<8x32xf32> -> vector<8x32xf32>
    %c0_11 = arith.constant 0 : index
    %c0_12 = arith.constant 0 : index
    %11 = vector.load %arg6[%c0_11, %c0_12] : memref<1x32xf32, #tpu.memory_space<vmem>>, vector<1x32xf32>
    %12 = vector.broadcast %11 : vector<1x32xf32> to vector<8x32xf32>
    %13 = arith.addf %10, %12 : vector<8x32xf32>
    %cst_13 = arith.constant 0.000000e+00 : f32
    %14 = vector.broadcast %cst_13 : f32 to vector<8x32xf32>
    %15 = arith.maximumf %13, %14 : vector<8x32xf32>
    %16 = vector.extract_strided_slice %15 {offsets = [0, 0], sizes = [1, 32], strides = [1, 1]} : vector<8x32xf32> to vector<1x32xf32>
    %17 = vector.shape_cast %16 : vector<1x32xf32> to vector<1x32xf32>
    %18 = vector.broadcast %17 : vector<1x32xf32> to vector<8x32xf32>
    %19 = vector.extract_strided_slice %15 {offsets = [1, 0], sizes = [1, 32], strides = [1, 1]} : vector<8x32xf32> to vector<1x32xf32>
    %20 = vector.shape_cast %19 : vector<1x32xf32> to vector<1x32xf32>
    %21 = vector.broadcast %20 : vector<1x32xf32> to vector<8x32xf32>
    %22 = vector.extract_strided_slice %15 {offsets = [2, 0], sizes = [1, 32], strides = [1, 1]} : vector<8x32xf32> to vector<1x32xf32>
    %23 = vector.shape_cast %22 : vector<1x32xf32> to vector<1x32xf32>
    %24 = vector.broadcast %23 : vector<1x32xf32> to vector<8x32xf32>
    %25 = vector.extract_strided_slice %15 {offsets = [3, 0], sizes = [1, 32], strides = [1, 1]} : vector<8x32xf32> to vector<1x32xf32>
    %26 = vector.shape_cast %25 : vector<1x32xf32> to vector<1x32xf32>
    %27 = vector.broadcast %26 : vector<1x32xf32> to vector<8x32xf32>
    %28 = vector.extract_strided_slice %15 {offsets = [4, 0], sizes = [1, 32], strides = [1, 1]} : vector<8x32xf32> to vector<1x32xf32>
    %29 = vector.shape_cast %28 : vector<1x32xf32> to vector<1x32xf32>
    %30 = vector.broadcast %29 : vector<1x32xf32> to vector<8x32xf32>
    %31 = vector.extract_strided_slice %15 {offsets = [5, 0], sizes = [1, 32], strides = [1, 1]} : vector<8x32xf32> to vector<1x32xf32>
    %32 = vector.shape_cast %31 : vector<1x32xf32> to vector<1x32xf32>
    %33 = vector.broadcast %32 : vector<1x32xf32> to vector<8x32xf32>
    %34 = vector.extract_strided_slice %15 {offsets = [6, 0], sizes = [1, 32], strides = [1, 1]} : vector<8x32xf32> to vector<1x32xf32>
    %35 = vector.shape_cast %34 : vector<1x32xf32> to vector<1x32xf32>
    %36 = vector.broadcast %35 : vector<1x32xf32> to vector<8x32xf32>
    %37 = vector.extract_strided_slice %15 {offsets = [7, 0], sizes = [1, 32], strides = [1, 1]} : vector<8x32xf32> to vector<1x32xf32>
    %38 = vector.shape_cast %37 : vector<1x32xf32> to vector<1x32xf32>
    %39 = vector.broadcast %38 : vector<1x32xf32> to vector<8x32xf32>
    %40 = tpu.concatenate %18, %21, %24, %27, %30, %33, %36, %39 in 0 : vector<8x32xf32>, vector<8x32xf32>, vector<8x32xf32>, vector<8x32xf32>, vector<8x32xf32>, vector<8x32xf32>, vector<8x32xf32>, vector<8x32xf32> -> vector<64x32xf32>
    %41 = arith.mulf %7, %40 : vector<64x32xf32>
    %42 = arith.truncf %41 : vector<64x32xf32> to vector<64x32xbf16>
    %c0_14 = arith.constant 0 : index
    %c0_15 = arith.constant 0 : index
    %43 = vector.load %arg7[%c0_14, %c0_15] : memref<32x32xbf16, #tpu.memory_space<vmem>>, vector<32x32xbf16>
    %cst_16 = arith.constant dense<0.000000e+00> : vector<64x32xf32>
    %44 = tpu.matmul %42, %43, %cst_16 {dimension_numbers = #tpu.dot_dimension_numbers<[1], [0], [0], [1], [0, 0, 1, 1], [], []>} : vector<64x32xbf16>, vector<32x32xbf16>, vector<64x32xf32> -> vector<64x32xf32>
    %c0_17 = arith.constant 0 : index
    %c0_18 = arith.constant 0 : index
    %45 = vector.load %arg8[%c0_17, %c0_18] : memref<1x32xf32, #tpu.memory_space<vmem>>, vector<1x32xf32>
    %46 = vector.broadcast %45 : vector<1x32xf32> to vector<64x32xf32>
    %47 = arith.addf %44, %46 : vector<64x32xf32>
    %cst_19 = arith.constant 0.000000e+00 : f32
    %48 = vector.broadcast %cst_19 : f32 to vector<64x32xf32>
    %49 = arith.maximumf %47, %48 : vector<64x32xf32>
    %c0_20 = arith.constant 0 : index
    %c0_21 = arith.constant 0 : index
    %50 = vector.load %arg9[%c0_20, %c0_21] : memref<1x32xf32, #tpu.memory_space<vmem>>, vector<1x32xf32>
    %51 = vector.broadcast %50 : vector<1x32xf32> to vector<64x32xf32>
    %52 = arith.mulf %49, %51 : vector<64x32xf32>
    %cst_22 = arith.constant dense<0.000000e+00> : vector<64xf32>
    %53 = vector.multi_reduction <add>, %52, %cst_22 [1] : vector<64x32xf32> to vector<64xf32>
    %54 = vector.shape_cast %53 : vector<64xf32> to vector<64x1xf32>
    %c0_23 = arith.constant 0 : index
    %55 = memref.load %arg10[%c0_23] : memref<1xf32, #tpu.memory_space<smem>>
    %56 = vector.broadcast %55 : f32 to vector<64x1xf32>
    %57 = arith.addf %54, %56 : vector<64x1xf32>
    %cst_24 = arith.constant 0.000000e+00 : f32
    %58 = vector.broadcast %cst_24 : f32 to vector<64x1xf32>
    %59 = arith.cmpf oge, %57, %58 : vector<64x1xf32>
    %cst_25 = arith.constant 0.00999999977 : f32
    %60 = vector.broadcast %cst_25 : f32 to vector<64x1xf32>
    %61 = arith.mulf %60, %57 : vector<64x1xf32>
    %62 = arith.select %59, %57, %61 : vector<64x1xi1>, vector<64x1xf32>
    %c0_26 = arith.constant 0 : index
    %c0_27 = arith.constant 0 : index
    %63 = vector.load %arg11[%c0_26, %c0_27] : memref<64x1xf32, #tpu.memory_space<vmem>>, vector<64x1xf32>
    tpu.vector_store %arg11[%c0_26, %c0_27], %62 {strides = array<i32>} : memref<64x1xf32, #tpu.memory_space<vmem>>, vector<64x1xf32>,
    return
  }
  func.func @transform_0(%arg0: i32) -> (i32, i32) {
    %c0_i32 = arith.constant 0 : i32
    %c0_i32_0 = arith.constant 0 : i32
    return %arg0, %c0_i32 : i32, i32
  }
  func.func @transform_1(%arg0: i32) -> (i32, i32) {
    %c0_i32 = arith.constant 0 : i32
    %c0_i32_0 = arith.constant 0 : i32
    return %arg0, %c0_i32 : i32, i32
  }
  func.func @transform_2(%arg0: i32) -> (i32, i32) {
    %c0_i32 = arith.constant 0 : i32
    %c0_i32_0 = arith.constant 0 : i32
    %c0_i32_1 = arith.constant 0 : i32
    return %c0_i32, %c0_i32_0 : i32, i32
  }
  func.func @transform_3(%arg0: i32) -> (i32, i32) {
    %c0_i32 = arith.constant 0 : i32
    %c0_i32_0 = arith.constant 0 : i32
    %c0_i32_1 = arith.constant 0 : i32
    return %c0_i32, %c0_i32_0 : i32, i32
  }
  func.func @transform_4(%arg0: i32) -> (i32, i32) {
    %c0_i32 = arith.constant 0 : i32
    %c0_i32_0 = arith.constant 0 : i32
    %c0_i32_1 = arith.constant 0 : i32
    return %c0_i32, %c0_i32_0 : i32, i32
  }
  func.func @transform_5(%arg0: i32) -> (i32, i32) {
    %c0_i32 = arith.constant 0 : i32
    %c0_i32_0 = arith.constant 0 : i32
    %c0_i32_1 = arith.constant 0 : i32
    return %c0_i32, %c0_i32_0 : i32, i32
  }
  func.func @transform_6(%arg0: i32) -> (i32, i32) {
    %c0_i32 = arith.constant 0 : i32
    %c0_i32_0 = arith.constant 0 : i32
    %c0_i32_1 = arith.constant 0 : i32
    return %c0_i32, %c0_i32_0 : i32, i32
  }
  func.func @transform_7(%arg0: i32) -> (i32, i32) {
    %c0_i32 = arith.constant 0 : i32
    %c0_i32_0 = arith.constant 0 : i32
    %c0_i32_1 = arith.constant 0 : i32
    return %c0_i32, %c0_i32_0 : i32, i32
  }
  func.func @transform_8(%arg0: i32) -> (i32, i32) {
    %c0_i32 = arith.constant 0 : i32
    %c0_i32_0 = arith.constant 0 : i32
    %c0_i32_1 = arith.constant 0 : i32
    return %c0_i32, %c0_i32_0 : i32, i32
  }
  func.func @transform_9(%arg0: i32) -> i32 {
    %c0_i32 = arith.constant 0 : i32
    %c0_i32_0 = arith.constant 0 : i32
    return %c0_i32 : i32
  }
  func.func @transform_10(%arg0: i32) -> (i32, i32) {
    %c0_i32 = arith.constant 0 : i32
    %c0_i32_0 = arith.constant 0 : i32
    return %arg0, %c0_i32 : i32, i32
  }
}

</mosaic_0001>

<bundles_post_ra>
// kernel: tpu_custom_call.1
= control target key start
LH: loop header
LB: loop body
LE: loop exit
PB: predicated region body
PF: predicated region fallthrough
CT: control target
= control target key end

     0   :  { %s1059_s15 = smov 0   ;;  %s1148_s0 = inlined_call_operand.vmem [shape: bf16[128,32], index: 0, kind: input, shape index: {}]   ;;  %s1149_s1 = inlined_call_operand.vmem [shape: bf16[16,32], index: 1, kind: input, shape index: {}]   ;;  %s1150_s2 = inlined_call_operand.vmem [shape: bf16[32,32], index: 2, kind: input, shape index: {}]   ;;  %s1151_s3 = inlined_call_operand.vmem [shape: f32[1,32], index: 3, kind: input, shape index: {}]   ;;  %s1152_s4 = inlined_call_operand.vmem [shape: bf16[32,32], index: 4, kind: input, shape index: {}]   ;;  %s1153_s5 = inlined_call_operand.vmem [shape: f32[1,32], index: 5, kind: input, shape index: {}]   ;;  %s1154_s6 = inlined_call_operand.vmem [shape: bf16[32,32], index: 6, kind: input, shape index: {}]   ;;  %s1155_s7 = inlined_call_operand.vmem [shape: f32[1,32], index: 7, kind: input, shape index: {}]   ;;  %s1156_s8 = inlined_call_operand.vmem [shape: f32[1,32], index: 8, kind: input, shape index: {}]   ;;  %s1157_s9 = inlined_call_operand.<no memory space> [shape: f32[1], index: 9, kind: input, shape index: {}]   ;;  %s1158_s10 = inlined_call_operand.vmem [shape: f32[128,1], index: 10, kind: output, shape index: {}]  }
   0x1   :  { %15 = sst [smem:[#allocation2]] %s1157_s9 }
   0x2 LB: > { %s889_s16 = sadd.s32 4294967295, %s997_s15   ;;  %p893_p0 = scmp.ge.s32.totalorder %s997_s15, 1  ;;  %s997_s15 = sphi %s1059_s15, %s21_s15  }
   0x3   : > { %p323_p1 = scmp.lt.s32.totalorder %s997_s15, 3 }
   0x5   : > { %p324_p2 = pnand %p893_p0, %p323_p1 }
   0x6   : > { %v981_v0 = vld [vmem:[%s1150_s2] sm:$0xff] (!%p324_p2)   ;;  %v999_v1 = vmov (!%p324_p2), 0.0   ;;  %v983_v3 = vld [vmem:[%s1150_s2 + $0x8] sm:$0xff] (!%p324_p2)   ;;  %vm1000_vm0 = vmmov (!%p324_p2), 0   ;;  %s894_s22 = sshll.u32 (!%p324_p2), %s889_s16, 3  ;;  %p371_p4 = scmp.lt.s32.totalorder (!%p324_p2), %s889_s16, 1  ;;  %v587_v12 = vlaneseq (!%p324_p2) }
   0x7   : > { %327 = sbr.rel (%p324_p2) target bundleno = 625 (0x271), region = 60  ;;  %951 = vmatprep.subr.bf16.mxu1 (!%p324_p2), %v999_v1  ;;  %v982_v2 = vld [vmem:[%s1152_s4] sm:$0xff] (!%p324_p2)   ;;  %939 = vmatprep.subr.bf16.mxu0 (!%p324_p2), %v981_v0  ;;  %v984_v4 = vld [vmem:[%s1152_s4 + $0x8] sm:$0xff] (!%p324_p2)   ;;  %p366_p3 = scmp.lt.s32.totalorder (!%p324_p2), %s894_s22, 15  ;;  %vm433_vm1 = vcmask (!%p324_p2), 261120   ;;  %vm812_vm2 = vcmask (!%p324_p2), 7168  }
   0x8   : > { %955 = vmatprep.mubr.msk.bf16.mxu1 (!%p324_p2), %vm1000_vm0, %v999_v1  ;;  %952 = vmatpush3.bf16.msra.mxu1 (!%p324_p2), %v982_v2  ;;  %v989_v10 = vld [vmem:[%s1154_s6] sm:$0xff] (!%p324_p2)   ;;  %v990_v11 = vld [vmem:[%s1154_s6 + $0x8] sm:$0xff] (!%p324_p2)   ;;  %v588_v13 = vshrl.u32 (!%p324_p2), %v587_v12, 7  ;;  %s778_s26 = sld [smem:[#allocation2]] (!%p324_p2) }
   0x9   : > { %940 = vmatpush3.bf16.msra.mxu0 (!%p324_p2), %v981_v0  ;;  %953 = vmatprep.subr.bf16.mxu1 (!%p324_p2), %v999_v1  ;;  %v910_v14 = vld [vmem:[%s1153_s5] ss:$0 sm:$0xff] (!%p324_p2) }
   0xa   : > { %941 = vmatprep.subr.bf16.mxu0 (!%p324_p2), %v983_v3  ;;  %v899_v15 = vld [vmem:[%s1151_s3] ss:$0 sm:$0xff] (!%p324_p2)  ;;  %v597_v18 = vsub.s32 (!%p324_p2), 2, %v588_v13  ;;  %v589_v23 = vsub.s32 (!%p324_p2), 0, %v588_v13  ;;  %v601_v24 = vsub.s32 (!%p324_p2), 3, %v588_v13  ;;  %v593_v28 = vsub.s32 (!%p324_p2), 1, %v588_v13 }
   0xb   : > { %v613_v45 = vsub.s32 (!%p324_p2), 6, %v588_v13  ;;  %v605_v48 = vsub.s32 (!%p324_p2), 4, %v588_v13  ;;  %v617_v52 = vsub.s32 (!%p324_p2), 7, %v588_v13  ;;  %v609_v56 = vsub.s32 (!%p324_p2), 5, %v588_v13 }
   0xc   : > { %954 = vmatpush3.bf16.msra.mxu1 (!%p324_p2), %v984_v4 }
   0xd   : > { %942 = vmatpush3.bf16.msra.mxu0 (!%p324_p2), %v983_v3  ;;  %959 = vmatprep.subr.bf16.mxu1 (!%p324_p2), %v989_v10 }
   0xe   : > { %s1160_s22 = smov (!%p366_p3, %s894_s22), 15  ;;  %s1162_s16 = smov (!%p371_p4, %s889_s16), 1 }
   0xf   : > { %s895_s25 = sshll.u32 %s1160_s22, 2  ;;  %s896_s29 = sshll.u32 %s1162_s16, 2 }
  0x10   : > { %s369_s28 = scalar_lea.vmem %s1148_s0, %s895_s25  ;;  %s374_s12 = scalar_lea.vmem %s1149_s1, %s896_s29 }
  0x11   : > { %v985_v5 = vld [vmem:[%s369_s28] sm:$0xff]   ;;  %v986_v6 = vld [vmem:[%s369_s28 + $0x8] sm:$0xff]   ;;  %v987_v8 = vld [vmem:[%s369_s28 + $0x10] sm:$0xff]   ;;  %s898_s27 = sshll.u32 %s1160_s22, 3 }
  0x12   : > { %943 = vmatprep.mubr.msk.bf16.mxu0 %vm433_vm1, %v985_v5  ;;  %v519_v7 = vld [vmem:[%s374_s12] sm:$0xf]  ;;  %v988_v9 = vld [vmem:[%s369_s28 + $0x18] sm:$0xff]   ;;  %s1127_s30 = scalar_lea.vmem %s1158_s10, %s898_s27 }
  0x13   : > { %956 = vmatmul.mubr.msk.bf16.vlgmr.msra.gmra.mrb[0].mxu1 %vm433_vm1, %v519_v7  ;;  %944 = vmatmul.mubr.msk.bf16.vlgmr.msra.gmra.mrb[0].mxu0 %vm433_vm1, %v986_v6 }
  0x14   : > { %947 = vmatprep.mubr.msk.bf16.mxu0 %vm433_vm1, %v987_v8  ;;  %960 = vmatpush3.bf16.msra.mxu1 %v989_v10  ;;  %v914_v10 = vld [vmem:[%s1155_s7] ss:$0 sm:$0xff] }
  0x15   : > { %961 = vmatprep.subr.bf16.mxu1 %v990_v11 }
  0x18   : > { %962 = vmatpush3.bf16.msra.mxu1 %v990_v11 }
  0x1b   : > { %948 = vmatmul.mubr.msk.bf16.gmra.mrb[4].mxu0 %vm433_vm1, %v988_v9 }
  0xe6   : > { %v580_v16 = vpop.f32.mrb[0].mxu1  ;;  %v945_v17 = vpop.f32.mrb[0].mxu0 }
  0xe7   : > { %v581_v19 = vadd.f32 %v910_v14, %v580_v16  ;;  %v489_v20 = vadd.f32 %v945_v17, %v899_v15  ;;  %v957_v21 = vpop.f32.mrb[1].mxu1  ;;  %v480_v22 = vpop.f32.mrb[1].mxu0  ;;  %v921_v16 = vld [vmem:[%s1156_s8] ss:$0 sm:$0xff] }
  0xe8   : > { %v481_v25 = vadd.f32 %v899_v15, %v480_v22  ;;  %v583_v26 = vpop.f32.mrb[2].mxu1  ;;  %v946_v27 = vpop.f32.mrb[2].mxu0 }
  0xe9   : > { %v586_v29 = vmax.f32 %v581_v19, 0.0  ;;  %v513_v30 = vmax.f32 %v489_v20, 0.0  ;;  %v492_v31 = vadd.f32 %v946_v27, %v899_v15  ;;  %v958_v32 = vpop.f32.mrb[3].mxu1  ;;  %v483_v33 = vpop.f32.mrb[3].mxu0 }
  0xea   : > { %v511_v34 = vmax.f32 %v481_v25, 0.0  ;;  %v484_v35 = vadd.f32 %v899_v15, %v483_v33 }
  0xeb   : > { %v598_v36 = vrot.slane %v586_v29, %v597_v18  ;;  %v590_v37 = vrot.slane %v586_v29, %v589_v23  ;;  %v514_v38 = vmax.f32 %v492_v31, 0.0  ;;  %v602_v39 = vrot.slane %v586_v29, %v601_v24 }
  0xec   : > { %v512_v40 = vmax.f32 %v484_v35, 0.0  ;;  %v594_v41 = vrot.slane %v586_v29, %v593_v28  ;;  %v614_v58 = vrot.slane %v586_v29, %v613_v45  ;;  %v606_v62 = vrot.slane %v586_v29, %v605_v48 }
  0xed   : > { %v621_v42 = vmul.f32 %v598_v36, %v513_v30  ;;  %v619_v43 = vmul.f32 %v590_v37, %v511_v34  ;;  %v622_v44 = vmul.f32 %v602_v39, %v514_v38  ;;  %v618_v2 = vrot.slane %v586_v29, %v617_v52 }
  0xee   : > { %v620_v46 = vmul.f32 %v594_v41, %v512_v40  ;;  %v949_v47 = vpop.f32.mrb[4].mxu0  ;;  %v610_v5 = vrot.slane %v586_v29, %v609_v56  ;;  %v779_v52 = vstv %s778_s26 }
  0xef   : > { %v628_v49 = vpack.c.bf16 %v622_v44, %v621_v42  ;;  %v505_v50 = vadd.f32 %v949_v47, %v899_v15  ;;  %v496_v51 = vpop.f32.mrb[5].mxu0 }
  0xf0   : > { %v627_v53 = vpack.c.bf16 %v620_v46, %v619_v43  ;;  %v497_v54 = vadd.f32 %v899_v15, %v496_v51  ;;  %v950_v55 = vpop.f32.mrb[6].mxu0 }
  0xf1   : > { %v517_v57 = vmax.f32 %v505_v50, 0.0  ;;  %v508_v59 = vadd.f32 %v950_v55, %v899_v15  ;;  %v499_v60 = vpop.f32.mrb[7].mxu0 }
  0xf2   : > { %v515_v61 = vmax.f32 %v497_v54, 0.0  ;;  %v500_v63 = vadd.f32 %v899_v15, %v499_v60  ;;  %963 = vmatprep.mubr.msk.bf16.mxu1 %vm433_vm1, %v627_v53 }
  0xf3   : > { %v625_v0 = vmul.f32 %v614_v58, %v517_v57  ;;  %v518_v1 = vmax.f32 %v508_v59, 0.0  ;;  %964 = vmatmul.mubr.msk.bf16.vlgmr.msra.gmra.mrb[4].mxu1 %vm433_vm1, %v628_v49 }
  0xf4   : > { %v623_v3 = vmul.f32 %v606_v62, %v515_v61  ;;  %v516_v4 = vmax.f32 %v500_v63, 0.0 }
  0xf5   : > { %v626_v6 = vmul.f32 %v618_v2, %v518_v1 }
  0xf6   : > { %v624_v7 = vmul.f32 %v610_v5, %v516_v4 }
  0xf7   : > { %v630_v8 = vpack.c.bf16 %v626_v6, %v625_v0 }
  0xf8   : > { %v629_v9 = vpack.c.bf16 %v624_v7, %v623_v3 }
  0xfa   : > { %967 = vmatprep.mubr.msk.bf16.mxu1 %vm433_vm1, %v629_v9 }
  0xfb   : > { %968 = vmatmul.mubr.msk.bf16.gmra.mrb[8].mxu1 %vm433_vm1, %v630_v8 }
 0x1c6   : > { %v965_v11 = vpop.f32.mrb[4].mxu1 }
 0x1c7   : > { %v709_v12 = vadd.f32 %v965_v11, %v914_v10  ;;  %v700_v13 = vpop.f32.mrb[5].mxu1 }
 0x1c8   : > { %v701_v14 = vadd.f32 %v914_v10, %v700_v13  ;;  %v966_v15 = vpop.f32.mrb[6].mxu1 }
 0x1c9   : > { %v733_v17 = vmax.f32 %v709_v12, 0.0  ;;  %v712_v18 = vadd.f32 %v966_v15, %v914_v10  ;;  %v703_v19 = vpop.f32.mrb[7].mxu1 }
 0x1ca   : > { %v731_v20 = vmax.f32 %v701_v14, 0.0  ;;  %v704_v21 = vadd.f32 %v914_v10, %v703_v19 }
 0x1cb   : > { %v734_v22 = vmax.f32 %v712_v18, 0.0  ;;  %v748_v23 = vmul.f32 %v921_v16, %v733_v17 }
 0x1cc   : > { %v732_v24 = vmax.f32 %v704_v21, 0.0  ;;  %v746_v25 = vmul.f32 %v921_v16, %v731_v20 }
 0x1cd   : > { %v760_v26 = vsel %vm433_vm1, %v748_v23, 0.0  ;;  %v749_v27 = vmul.f32 %v921_v16, %v734_v22 }
 0x1ce   : > { %761 = vadd.xlane.f32.xlu1 %v760_v26  ;;  %v969_v28 = vpop.f32.mrb[8].mxu1  ;;  %v754_v29 = vsel %vm433_vm1, %v746_v25, 0.0  ;;  %v747_v30 = vmul.f32 %v921_v16, %v732_v24 }
 0x1cf   : > { %v725_v31 = vadd.f32 %v969_v28, %v914_v10  ;;  %v716_v32 = vpop.f32.mrb[9].mxu1  ;;  %755 = vadd.xlane.f32.xlu0 %v754_v29  ;;  %v763_v37 = vsel %vm433_vm1, %v749_v27, 0.0 }
 0x1d0   : > { %v717_v33 = vadd.f32 %v914_v10, %v716_v32  ;;  %v970_v34 = vpop.f32.mrb[10].mxu1  ;;  %v757_v41 = vsel %vm433_vm1, %v747_v30, 0.0 }
 0x1d1   : > { %v728_v35 = vadd.f32 %v970_v34, %v914_v10  ;;  %v719_v36 = vpop.f32.mrb[11].mxu1  ;;  %v737_v38 = vmax.f32 %v725_v31, 0.0 }
 0x1d2   : > { %v735_v39 = vmax.f32 %v717_v33, 0.0  ;;  %v720_v40 = vadd.f32 %v914_v10, %v719_v36  ;;  %764 = vadd.xlane.f32.xlu1 %v763_v37 }
 0x1d3   : > { %758 = vadd.xlane.f32.xlu0 %v757_v41  ;;  %v738_v42 = vmax.f32 %v728_v35, 0.0  ;;  %v752_v47 = vmul.f32 %v921_v16, %v737_v38 }
 0x1d4   : > { %v736_v43 = vmax.f32 %v720_v40, 0.0  ;;  %v750_v44 = vmul.f32 %v921_v16, %v735_v39 }
 0x1d5   : > { %v753_v49 = vmul.f32 %v921_v16, %v738_v42  ;;  %v772_v50 = vsel %vm433_vm1, %v752_v47, 0.0 }
 0x1d6   : > { %v766_v45 = vsel %vm433_vm1, %v750_v44, 0.0  ;;  %v751_v46 = vmul.f32 %v921_v16, %v736_v43 }
 0x1d7   : > { %767 = vadd.xlane.f32.xlu0 %v766_v45  ;;  %v775_v51 = vsel %vm433_vm1, %v753_v49, 0.0 }
 0x1d8   : > { %v769_v48 = vsel %vm433_vm1, %v751_v46, 0.0 }
 0x1d9   : > { %770 = vadd.xlane.f32.xlu1 %v769_v48 }
 0x1db   : > { %773 = vadd.xlane.f32.xlu0 %v772_v50 }
 0x1dd   : > { %776 = vadd.xlane.f32.xlu1 %v775_v51 }
 0x25b   : > { %v762_v53 = vpop.xlane.xlu1 %761 }
 0x25c   : > { %v782_v54 = vadd.f32 %v779_v52, %v762_v53  ;;  %v756_v55 = vpop.xlane.xlu0 %755 }
 0x25d   : > { %v780_v56 = vadd.f32 %v779_v52, %v756_v55 }
 0x25e   : > { %vm790_vm3 = vcmp.ge.f32.partialorder %v782_v54, 0.0  ;;  %v798_v57 = vmul.f32 0.01, %v782_v54 }
 0x25f   : > { %vm788_vm4 = vcmp.ge.f32.partialorder %v780_v56, 0.0  ;;  %v796_v58 = vmul.f32 0.01, %v780_v56  ;;  %v765_v59 = vpop.xlane.xlu1 %764 }
 0x260   : > { %v806_v60 = vsel %vm790_vm3, %v782_v54, %v798_v57  ;;  %v783_v61 = vadd.f32 %v779_v52, %v765_v59  ;;  %v759_v62 = vpop.xlane.xlu0 %758 }
 0x261   : > { %815 = vst.msk [vmem:[%s1127_s30 + $0x10] sm:$0xff] %vm812_vm2, %v806_v60  ;;  %v804_v63 = vsel %vm788_vm4, %v780_v56, %v796_v58  ;;  %v781_v0 = vadd.f32 %v779_v52, %v759_v62 }
 0x262   : > { %813 = vst.msk [vmem:[%s1127_s30] sm:$0xff] %vm812_vm2, %v804_v63  ;;  %vm791_vm5 = vcmp.ge.f32.partialorder %v783_v61, 0.0  ;;  %v799_v1 = vmul.f32 0.01, %v783_v61 }
 0x263   : > { %vm789_vm6 = vcmp.ge.f32.partialorder %v781_v0, 0.0  ;;  %v797_v2 = vmul.f32 0.01, %v781_v0 }
 0x264   : > { %v807_v3 = vsel %vm791_vm5, %v783_v61, %v799_v1  ;;  %v768_v4 = vpop.xlane.xlu0 %767 }
 0x265   : > { %816 = vst.msk [vmem:[%s1127_s30 + $0x18] sm:$0xff] %vm812_vm2, %v807_v3  ;;  %v805_v5 = vsel %vm789_vm6, %v781_v0, %v797_v2  ;;  %v784_v6 = vadd.f32 %v779_v52, %v768_v4 }
 0x266   : > { %814 = vst.msk [vmem:[%s1127_s30 + $0x8] sm:$0xff] %vm812_vm2, %v805_v5  ;;  %v771_v7 = vpop.xlane.xlu1 %770 }
 0x267   : > { %vm792_vm7 = vcmp.ge.f32.partialorder %v784_v6, 0.0  ;;  %v800_v8 = vmul.f32 0.01, %v784_v6  ;;  %v785_v9 = vadd.f32 %v779_v52, %v771_v7 }
 0x268   : > { %v774_v10 = vpop.xlane.xlu0 %773 }
 0x269   : > { %v808_v11 = vsel %vm792_vm7, %v784_v6, %v800_v8  ;;  %vm793_vm8 = vcmp.ge.f32.partialorder %v785_v9, 0.0  ;;  %v801_v12 = vmul.f32 0.01, %v785_v9  ;;  %v786_v13 = vadd.f32 %v779_v52, %v774_v10 }
 0x26a   : > { %817 = vst.msk [vmem:[%s1127_s30 + $0x20] sm:$0xff] %vm812_vm2, %v808_v11  ;;  %v777_v14 = vpop.xlane.xlu1 %776 }
 0x26b   : > { %v809_v15 = vsel %vm793_vm8, %v785_v9, %v801_v12  ;;  %vm794_vm9 = vcmp.ge.f32.partialorder %v786_v13, 0.0  ;;  %v802_v16 = vmul.f32 0.01, %v786_v13  ;;  %v787_v17 = vadd.f32 %v779_v52, %v777_v14 }
 0x26c   : > { %818 = vst.msk [vmem:[%s1127_s30 + $0x28] sm:$0xff] %vm812_vm2, %v809_v15 }
 0x26d   : > { %v810_v18 = vsel %vm794_vm9, %v786_v13, %v802_v16  ;;  %vm795_vm10 = vcmp.ge.f32.partialorder %v787_v17, 0.0  ;;  %v803_v19 = vmul.f32 0.01, %v787_v17 }
 0x26e   : > { %819 = vst.msk [vmem:[%s1127_s30 + $0x30] sm:$0xff] %vm812_vm2, %v810_v18 }
 0x26f   : > { %v811_v20 = vsel %vm795_vm10, %v787_v17, %v803_v19 }
 0x270   : > { %820 = vst.msk [vmem:[%s1127_s30 + $0x38] sm:$0xff] %vm812_vm2, %v811_v20 }
 0x271 PF: > { %s21_s15 = sadd.s32 1, %s997_s15  }
 0x272   : > { %p18_p5 = scmp.ge.s32.totalorder %s21_s15, 4  }
 0x274   :  { %20 = sbr.rel (!%p18_p5) target bundleno = 2 (0x2), region = 93 }

</bundles_post_ra>
